<compile_context>
chip_gen: v5e
topology: v5e:2x2
jax: 0.10.0
libtpu: 0.0.40
codegen_flags: <defaults>
</compile_context>

<pallas_src>
import jax
import jax.numpy as jnp
from jax.experimental import pallas as pl
from jax.experimental.pallas import tpu as pltpu

_LANE = 128                          # TPU vreg lane width
_MAX_TILE_BYTES = 8 * 1024 * 1024    # 8 MiB block -> 32 MiB double-buffered VMEM
_VMEM_LIMIT = 48 * 1024 * 1024       # under v7x's 64 MiB physical VMEM


def _noop_kernel(x_ref, o_ref):
    # Output HBM buffer is aliased to the input; nothing to move.
    # touch() pins a fake read+write dep so the aliased output materializes.
    del x_ref
    pltpu.touch(o_ref)


def _copy_kernel(x_ref, o_ref):
    # Straight VMEM load -> store of the current lane-dense tile.
    o_ref[...] = x_ref[...]


def _identity_noop(x: jnp.ndarray) -> jnp.ndarray:
    """Zero-HBM-traffic identity: ANY memory space + alias + no-op body."""
    return pl.pallas_call(
        _noop_kernel,
        out_shape=jax.ShapeDtypeStruct(x.shape, x.dtype),
        in_specs=[pl.BlockSpec(memory_space=pl.ANY)],
        out_specs=pl.BlockSpec(memory_space=pl.ANY),
        input_output_aliases={0: 0},
    )(x)


def _identity_copy(x: jnp.ndarray) -> jnp.ndarray:
    """Fallback: tiled, lane-dense, double-buffered HBM copy (still identity)."""
    total = x.size
    itemsize = jnp.dtype(x.dtype).itemsize

    # dtype-aware sublane packing: 8 rows (f32), 16 (bf16/f16), 32 (int8/fp8).
    sublane = max(8, 32 // itemsize)
    align = sublane * _LANE

    flat = x.reshape(-1)
    padded = total if total % align == 0 else ((total // align) + 1) * align
    if padded != total:
        flat = jnp.pad(flat, (0, padded - total))

    rows = padded // _LANE
    x2 = flat.reshape(rows, _LANE)

    bytes_per_row = _LANE * itemsize
    tile_rows = _MAX_TILE_BYTES // bytes_per_row
    tile_rows = max(sublane, (tile_rows // sublane) * sublane)
    tile_rows = min(tile_rows, rows)

    grid = (pl.cdiv(rows, tile_rows),)
    spec = pl.BlockSpec((tile_rows, _LANE), lambda i: (i, 0))

    y2 = pl.pallas_call(
        _copy_kernel,
        out_shape=jax.ShapeDtypeStruct(x2.shape, x2.dtype),
        grid=grid,
        in_specs=[spec],
        out_specs=spec,
        input_output_aliases={0: 0},
        cost_estimate=pl.CostEstimate(
            flops=0, transcendentals=0,
            bytes_accessed=2 * padded * itemsize),
        compiler_params=pltpu.CompilerParams(
            dimension_semantics=("parallel",),
            vmem_limit_bytes=_VMEM_LIMIT,
        ),
    )(x2)

    y = y2.reshape(-1)
    if padded != total:
        y = y[:total]
    return y.reshape(x.shape)


def root_forward(x: jnp.ndarray) -> jnp.ndarray:
    """Pallas implementation of Root.forward(x) -> x (identity)."""
    if x.size == 0:
        return x
    try:
        return _identity_noop(x)
    except Exception:
        # If the no-op lowering is ever rejected, fall back to a tiled copy.
        return _identity_copy(x)


if __name__ == "__main__":
    key = jax.random.PRNGKey(0)
    # Small NCHW input consistent with a conv-style search-space module.
    x = jax.random.normal(key, (2, 4, 16, 16), dtype=jnp.float32)

    # Primary (no-op, alias-only) path.
    y = root_forward(x)
    jax.block_until_ready(y)
    assert y.shape == x.shape and y.dtype == x.dtype
    assert bool(jnp.all(y == x))

    # Also exercise the tiled-copy fallback path for correctness.
    y2 = _identity_copy(x)
    jax.block_until_ready(y2)
    assert y2.shape == x.shape and y2.dtype == x.dtype
    assert bool(jnp.all(y2 == x))

    print("KERNEL_OK")
</pallas_src>

<mosaic_0001>
module attributes {stable_mosaic.version = 11 : i64} {
  func.func @_noop_kernel(%arg0: memref<2x4x16x16xf32, #tpu.memory_space<any>>, %arg1: memref<2x4x16x16xf32, #tpu.memory_space<any>>) attributes {dimension_semantics = [], scalar_prefetch = 0 : i64, scratch_operands = 0 : i64, tpu.core_type = #tpu.core_type<tc>} {
    return
  }
}

module attributes {stable_mosaic.version = 11 : i64} {
  func.func @_copy_kernel(%arg0: i32, %arg1: memref<16x128xf32, #tpu.memory_space<vmem>>, %arg2: memref<16x128xf32, #tpu.memory_space<vmem>>) attributes {dimension_semantics = [#tpu.dimension_semantics<parallel>], iteration_bounds = array<i64: 1>, scalar_prefetch = 0 : i64, scratch_operands = 0 : i64, tpu.core_type = #tpu.core_type<tc>, window_params = [{transform_indices = @transform_0, window_bounds = array<i64: 16, 128>}, {transform_indices = @transform_1, window_bounds = array<i64: 16, 128>}]} {
    %c0 = arith.constant 0 : index
    %c0_0 = arith.constant 0 : index
    %0 = vector.load %arg1[%c0, %c0_0] : memref<16x128xf32, #tpu.memory_space<vmem>>, vector<16x128xf32>
    %c0_1 = arith.constant 0 : index
    %c0_2 = arith.constant 0 : index
    %1 = vector.load %arg2[%c0_1, %c0_2] : memref<16x128xf32, #tpu.memory_space<vmem>>, vector<16x128xf32>
    tpu.vector_store %arg2[%c0_1, %c0_2], %0 {strides = array<i32>} : memref<16x128xf32, #tpu.memory_space<vmem>>, vector<16x128xf32>,
    return
  }
  func.func @transform_0(%arg0: i32) -> (i32, i32) {
    %c0_i32 = arith.constant 0 : i32
    %c0_i32_0 = arith.constant 0 : i32
    return %arg0, %c0_i32 : i32, i32
  }
  func.func @transform_1(%arg0: i32) -> (i32, i32) {
    %c0_i32 = arith.constant 0 : i32
    %c0_i32_0 = arith.constant 0 : i32
    return %arg0, %c0_i32 : i32, i32
  }
}

</mosaic_0001>

<bundles_post_ra>
// kernel: tpu_custom_call.1
= control target key start
LH: loop header
LB: loop body
LE: loop exit
PB: predicated region body
PF: predicated region fallthrough
CT: control target
= control target key end

     0   :  { %s16_s0 = inlined_call_operand.hbm [shape: f32[2,4,16,16], index: 0, kind: input, shape index: {}, may-alias: {0,1}]   ;;  %s17_s1 = inlined_call_operand.hbm [shape: f32[2,4,16,16], index: 1, kind: output, shape index: {}, may-alias: {0,1}]  }

// kernel: tpu_custom_call.1
= control target key start
LH: loop header
LB: loop body
LE: loop exit
PB: predicated region body
PF: predicated region fallthrough
CT: control target
= control target key end

     0   :  { %6 = vsyncpa [#allocation3], 0  ;;  %s124_s0 = inlined_call_operand.hbm [shape: f32[16,128], index: 0, kind: input, shape index: {}, may-alias: {0,1}]   ;;  %s125_s1 = inlined_call_operand.hbm [shape: f32[16,128], index: 1, kind: output, shape index: {}, may-alias: {0,1}]  }
   0x1   :  { %7 = vsyncpa [#allocation4], 0  ;;  %s12_s8 = sshll.u32 %s124_s0, 4  ;;  %s104_s9 = smov [#allocation2]   ;;  %s13_s8 = int_to_ptr.hbm [resolvable:$true] %s12_s8 }
   0x2   :  { %s14_s10 = sshll.u32 %s104_s9, 4  ;;  %s105_s11 = smov 128   ;;  %s15_s10 = int_to_ptr.vmem [resolvable:$true] %s14_s10 }
   0x3   :  { %s106_s12 = smov 8  }
   0x4   :  { %20 = dma.hbm_to_vmem [thread:$0]  %s13_s8, 256, %s15_s10, [#allocation3], %s105_s11, %s105_s11, %s106_s12  }
   0x5   :  { %100 = dma.done.wait [#allocation3], 256  }
   0x6   :  { %101 = vsyncadd [#allocation3], 4294967040  ;;  %s107_s13 = smov [#allocation5]   ;;  %s35_s17 = sshll.u32 %s125_s1, 4  ;;  %v25_v0 = vld [vmem:[#allocation2] sm:$0xff]  ;;  %v26_v1 = vld [vmem:[#allocation2 + $0x8] sm:$0xff]  ;;  %s36_s17 = int_to_ptr.hbm [resolvable:$true] %s35_s17 }
   0x7   :  { %s33_s14 = sshll.u32 %s107_s13, 4  ;;  %27 = vst [vmem:[#allocation5] sm:$0xff] %v25_v0  ;;  %s34_s14 = int_to_ptr.vmem [resolvable:$true] %s33_s14 }
   0x8   :  { %28 = vst [vmem:[#allocation5 + $0x8] sm:$0xff] %v26_v1 }
   0x9   :  { %41 = dma.vmem_to_hbm [thread:$0]  %s34_s14, 256, %s36_s17, [#allocation4], %s105_s11, %s105_s11, %s106_s12  }
   0xa   :  { %102 = dma.done.wait [#allocation4], 256  }
   0xb   :  { %103 = vsyncadd [#allocation4], 4294967040 }
   0xc   :  { %46 = vsyncpa [#allocation3], 1 }
   0xd   :  { %47 = vsyncpa [#allocation4], 1 }

</bundles_post_ra>
